<compile_context>
chip_gen: v5e
topology: v5e:2x2
jax: 0.10.0
libtpu: 0.0.40
codegen_flags: <defaults>
</compile_context>

<pallas_src>
from functools import partial

import jax
import jax.numpy as jnp
import numpy as np
from jax.experimental import pallas as pl
from jax.experimental.pallas import tpu as pltpu


def _gcn_kernel(u_ref, l_ref, x_ref, w_ref, h_ref, b_ref, out_ref, *,
                filter_length, feature_dim):
    """One grid step == a block of B graphs, graph axis on lanes.

    u_ref:   (N, N, B)  VMEM  eigenvectors, [node i, eigen m, graph b]
    l_ref:   (N, B)     VMEM  eigenvalues,  [eigen m, graph b]
    x_ref:   (F, N, B)  VMEM  node features, [feat f, node i, graph b]
    w_ref:   (F,)       SMEM  readout weight Linear(F, 1)
    h_ref:   (K,)       SMEM  spectral filter taps
    b_ref:   (1,)       SMEM  readout bias
    out_ref: (1, B)     VMEM  per-graph scalar outputs (lane-dense row)
    """
    U = u_ref[...]                                       # (N, N, B), read once
    Lv = l_ref[...]                                      # (N, B)

    # ---- fused readout y = X @ W^T as F unrolled scalar MACs on (N, B) slabs ----
    y = x_ref[0] * w_ref[0]                              # (N, B)
    for f in range(1, feature_dim):
        y = y + x_ref[f] * w_ref[f]

    # ---- spectral projections from a single traversal of U (no MXU/transpose) ----
    z = jnp.sum(U * y[:, None, :], axis=0)               # (N, B)  z[m,b] = sum_i U[i,m,b] y[i,b]
    s = jnp.sum(U, axis=0)                               # (N, B)  s[m,b] = sum_i U[i,m,b]

    # ---- diagonal filter d(lambda) = sum_k h_k lambda^k  (Horner on the VPU) ----
    d = jnp.full_like(Lv, h_ref[filter_length - 1])
    for k in range(filter_length - 2, -1, -1):
        d = d * Lv + h_ref[k]

    # ---- out_b = sum_m d[m] * s[m] * z[m] + bias  (sublane reduce -> (1, B)) ----
    val = jnp.sum(d * s * z, axis=0, keepdims=True)      # (1, B)
    out_ref[...] = val + b_ref[0]


def _pad_graphs(a, g_padded):
    g = a.shape[0]
    if g_padded == g:
        return a
    pad = [(0, g_padded - g)] + [(0, 0)] * (a.ndim - 1)
    return jnp.pad(a, pad)


def gcn_pallas(U, L, X, h, W, b, *, graphs_per_step=128):
    """Run the spectral GCN forward pass for all graphs.

    U: (G, N, N), L: (G, N), X: (G, N, F), h: (K,), W: (1, F), b: (1,)
    returns: (G,) float32
    """
    G, N, _ = U.shape
    F = X.shape[-1]
    K = int(h.shape[0])

    # ---- choose B = graphs per grid step -------------------------------------
    per_graph_bytes = 4 * (N * N + N * F + N)            # U + X + L, f32
    VMEM_INPUT_BUDGET = 32 * 1024 * 1024                  # double-buffered inputs, all gens
    b_vmem = max(1, VMEM_INPUT_BUDGET // (2 * per_graph_bytes))
    B = max(1, min(graphs_per_step, G, b_vmem))
    if G >= 2:                                             # keep >=2 grid steps (v7x megacore)
        B = min(B, (G + 1) // 2)
    # prefer a nearby divisor of G -> no jnp.pad HBM pass over U
    for cand in range(B, max(B // 2, 1) - 1, -1):
        if G % cand == 0:
            B = cand
            break
    S = -(-G // B)                                         # grid steps
    Gp = S * B

    f32 = jnp.float32
    # NOTE: padding stays AFTER eigh so padded graphs are exact zeros (bias-only
    # outputs, sliced off below).
    U_p = _pad_graphs(U.astype(f32), Gp)                   # (Gp, N, N)
    L_p = _pad_graphs(L.astype(f32), Gp)                   # (Gp, N)
    X_p = _pad_graphs(X.astype(f32), Gp)                   # (Gp, N, F)

    # ---- repack: graph axis -> lanes (last dim); wrapper-side layout plumbing ----
    U_k = U_p.reshape(S, B, N, N).transpose(0, 2, 3, 1)    # (S, N, N, B)  [i, m, b]
    L_k = L_p.reshape(S, B, N).transpose(0, 2, 1)          # (S, N, B)     [m, b]
    X_k = X_p.reshape(S, B, N, F).transpose(0, 3, 2, 1)    # (S, F, N, B)  [f, i, b]

    w_vec = W.reshape(F).astype(f32)
    h_vec = h.reshape(K).astype(f32)
    b_vec = b.reshape(1).astype(f32)

    vmem_need = 2 * B * per_graph_bytes + 2 * 4 * B + (1 << 20)
    vmem_limit = int(min(max(vmem_need, 16 << 20), 48 << 20))   # <= 48 MiB: ok on v7x (64 MiB)

    cost = pl.CostEstimate(
        flops=int(Gp * (2 * N * F + 3 * N * N + 2 * N * K + 4 * N)),
        transcendentals=0,
        bytes_accessed=int(4 * (Gp * (N * N + N * F + N + 1) + F + K + 1)),
    )

    out = pl.pallas_call(
        partial(_gcn_kernel, filter_length=K, feature_dim=F),
        out_shape=jax.ShapeDtypeStruct((S, 1, B), f32),
        grid=(S,),
        in_specs=[
            pl.BlockSpec((None, N, N, B), lambda g: (g, 0, 0, 0)),      # U
            pl.BlockSpec((None, N, B), lambda g: (g, 0, 0)),            # L
            pl.BlockSpec((None, F, N, B), lambda g: (g, 0, 0, 0)),      # X
            pl.BlockSpec(memory_space=pltpu.MemorySpace.SMEM),          # W taps (scalars)
            pl.BlockSpec(memory_space=pltpu.MemorySpace.SMEM),          # h taps (scalars)
            pl.BlockSpec(memory_space=pltpu.MemorySpace.SMEM),          # bias (scalar)
        ],
        out_specs=pl.BlockSpec((None, 1, B), lambda g: (g, 0, 0)),      # lane-dense row
        compiler_params=pltpu.CompilerParams(
            dimension_semantics=("parallel",),                          # megacore-shardable
            vmem_limit_bytes=vmem_limit,
        ),
        cost_estimate=cost,
    )(U_k, L_k, X_k, w_vec, h_vec, b_vec)

    return out.reshape(Gp)[:G]


def graph_conv_nn_forward(x, edge_index, batch, h, W, b, *, num_graphs, nodes_per_graph):
    """Full forward: sparse->dense batching + eigh in plain JAX, hot path in Pallas."""
    G, N = num_graphs, nodes_per_graph
    F = x.shape[-1]

    # to_dense_batch (all graphs have exactly N nodes, laid out contiguously)
    X = x.reshape(G, N, F)

    # to_dense_adj
    to_node, from_node = edge_index[0], edge_index[1]
    g_of_edge = batch[to_node]
    li = to_node - g_of_edge * N
    lj = from_node - g_of_edge * N
    A = jnp.zeros((G, N, N), jnp.float32).at[g_of_edge, li, lj].set(1.0)

    # TODO(synk): torch.linalg.eigh has no Pallas equivalent; computed with jnp.linalg.eigh.
    L, U = jnp.linalg.eigh(A)

    return gcn_pallas(U, L, X, h, W, b)


def _reference_forward(x, edge_index, batch, h, W, b, *, num_graphs, nodes_per_graph):
    """Pure-JAX mirror of the PyTorch module (for a numerical check)."""
    G, N = num_graphs, nodes_per_graph
    F = x.shape[-1]
    K = h.shape[0]
    X = x.reshape(G, N, F)
    to_node, from_node = edge_index[0], edge_index[1]
    g_of_edge = batch[to_node]
    A = jnp.zeros((G, N, N), jnp.float32).at[
        g_of_edge, to_node - g_of_edge * N, from_node - g_of_edge * N].set(1.0)
    L, U = jnp.linalg.eigh(A)
    expL = jnp.stack([L ** k for k in range(K)], axis=-1)          # (G, N, K)
    diag = (h[None, None] * expL).sum(-1, keepdims=True)           # (G, N, 1)
    node_state = U @ (diag * (jnp.swapaxes(U, 1, 2) @ X))          # (G, N, F)
    graph_state = node_state.sum(1)                                # (G, F)
    return (graph_state @ W.T + b).flatten()                       # (G,)


def _make_example(num_graphs, nodes_per_graph, feat_dim, key):
    """Deterministic batch of ring graphs (symmetric adjacency for eigh)."""
    G, N = num_graphs, nodes_per_graph
    edges = []
    for g in range(G):
        off = g * N
        for i in range(N):
            j = (i + 1) % N
            edges.append((off + i, off + j))
            edges.append((off + j, off + i))
        # one extra chord per graph (both directions) to make graphs distinct
        a, bnode = off, off + 2 + g
        edges.append((a, bnode))
        edges.append((bnode, a))
    edge_index = jnp.asarray(np.array(edges, dtype=np.int32).T)          # (2, E)
    batch = jnp.asarray(np.repeat(np.arange(G, dtype=np.int32), N))      # (G*N,)
    x = jax.random.normal(key, (G * N, feat_dim), jnp.float32)
    return x, edge_index, batch


if __name__ == "__main__":
    NODE_FEATURE_DIM = 8     # F
    FILTER_LENGTH = 4        # K
    NUM_GRAPHS = 2           # G
    NODES_PER_GRAPH = 16     # N

    key = jax.random.PRNGKey(0)
    k_h, k_w, k_b, k_x = jax.random.split(key, 4)

    # Parameters (deterministic, mirrors GraphConvNN.__init__)
    h = 1e-5 * jax.random.normal(k_h, (FILTER_LENGTH,), jnp.float32)
    h = h.at[0].set(1.0)
    bound = 1.0 / (NODE_FEATURE_DIM ** 0.5)          # nn.Linear default init range
    W = jax.random.uniform(k_w, (1, NODE_FEATURE_DIM), jnp.float32, -bound, bound)
    b = jax.random.uniform(k_b, (1,), jnp.float32, -bound, bound)

    x, edge_index, batch = _make_example(NUM_GRAPHS, NODES_PER_GRAPH, NODE_FEATURE_DIM, k_x)

    out = graph_conv_nn_forward(
        x, edge_index, batch, h, W, b,
        num_graphs=NUM_GRAPHS, nodes_per_graph=NODES_PER_GRAPH)
    out = jax.block_until_ready(out)

    ref = _reference_forward(
        x, edge_index, batch, h, W, b,
        num_graphs=NUM_GRAPHS, nodes_per_graph=NODES_PER_GRAPH)
    ref = jax.block_until_ready(ref)

    np.testing.assert_allclose(np.asarray(out), np.asarray(ref), rtol=1e-3, atol=1e-4)
    print("KERNEL_OK")
</pallas_src>

<mosaic_0001>
module attributes {stable_mosaic.version = 11 : i64} {
  func.func @_gcn_kernel(%arg0: i32, %arg1: memref<1x16x16x1xf32, #tpu.memory_space<vmem>>, %arg2: memref<1x16x1xf32, #tpu.memory_space<vmem>>, %arg3: memref<1x8x16x1xf32, #tpu.memory_space<vmem>>, %arg4: memref<8xf32, #tpu.memory_space<smem>>, %arg5: memref<4xf32, #tpu.memory_space<smem>>, %arg6: memref<1xf32, #tpu.memory_space<smem>>, %arg7: memref<1x1x1xf32, #tpu.memory_space<vmem>>) attributes {dimension_semantics = [#tpu.dimension_semantics<parallel>], iteration_bounds = array<i64: 2>, scalar_prefetch = 0 : i64, scratch_operands = 0 : i64, tpu.core_type = #tpu.core_type<tc>, window_params = [{transform_indices = @transform_0, window_bounds = array<i64: 1, 16, 16, 1>}, {transform_indices = @transform_1, window_bounds = array<i64: 1, 16, 1>}, {transform_indices = @transform_2, window_bounds = array<i64: 1, 8, 16, 1>}, {transform_indices = @transform_3, window_bounds = array<i64: 8>}, {transform_indices = @transform_4, window_bounds = array<i64: 4>}, {transform_indices = @transform_5, window_bounds = array<i64: 1>}, {transform_indices = @transform_6, window_bounds = array<i64: 1, 1, 1>}]} {
    %c0 = arith.constant 0 : index
    %c0_0 = arith.constant 0 : index
    %c0_1 = arith.constant 0 : index
    %c0_2 = arith.constant 0 : index
    %0 = vector.load %arg1[%c0, %c0_0, %c0_1, %c0_2] : memref<1x16x16x1xf32, #tpu.memory_space<vmem>>, vector<1x16x16x1xf32>
    %1 = vector.shape_cast %0 : vector<1x16x16x1xf32> to vector<16x16x1xf32>
    %c0_3 = arith.constant 0 : index
    %c0_4 = arith.constant 0 : index
    %c0_5 = arith.constant 0 : index
    %2 = vector.load %arg2[%c0_3, %c0_4, %c0_5] : memref<1x16x1xf32, #tpu.memory_space<vmem>>, vector<1x16x1xf32>
    %3 = vector.shape_cast %2 : vector<1x16x1xf32> to vector<16x1xf32>
    %c0_6 = arith.constant 0 : index
    %c0_7 = arith.constant 0 : index
    %c0_8 = arith.constant 0 : index
    %c0_9 = arith.constant 0 : index
    %4 = vector.load %arg3[%c0_6, %c0_7, %c0_8, %c0_9] : memref<1x8x16x1xf32, #tpu.memory_space<vmem>>, vector<1x1x16x1xf32>
    %5 = vector.shape_cast %4 : vector<1x1x16x1xf32> to vector<16x1xf32>
    %c0_10 = arith.constant 0 : index
    %6 = memref.load %arg4[%c0_10] : memref<8xf32, #tpu.memory_space<smem>>
    %7 = vector.broadcast %6 : f32 to vector<16x1xf32>
    %8 = arith.mulf %5, %7 : vector<16x1xf32>
    %c0_11 = arith.constant 0 : index
    %c1 = arith.constant 1 : index
    %c0_12 = arith.constant 0 : index
    %c0_13 = arith.constant 0 : index
    %9 = vector.load %arg3[%c0_11, %c1, %c0_12, %c0_13] : memref<1x8x16x1xf32, #tpu.memory_space<vmem>>, vector<1x1x16x1xf32>
    %10 = vector.shape_cast %9 : vector<1x1x16x1xf32> to vector<16x1xf32>
    %c1_14 = arith.constant 1 : index
    %11 = memref.load %arg4[%c1_14] : memref<8xf32, #tpu.memory_space<smem>>
    %12 = vector.broadcast %11 : f32 to vector<16x1xf32>
    %13 = arith.mulf %10, %12 : vector<16x1xf32>
    %14 = arith.addf %8, %13 : vector<16x1xf32>
    %c0_15 = arith.constant 0 : index
    %c2 = arith.constant 2 : index
    %c0_16 = arith.constant 0 : index
    %c0_17 = arith.constant 0 : index
    %15 = vector.load %arg3[%c0_15, %c2, %c0_16, %c0_17] : memref<1x8x16x1xf32, #tpu.memory_space<vmem>>, vector<1x1x16x1xf32>
    %16 = vector.shape_cast %15 : vector<1x1x16x1xf32> to vector<16x1xf32>
    %c2_18 = arith.constant 2 : index
    %17 = memref.load %arg4[%c2_18] : memref<8xf32, #tpu.memory_space<smem>>
    %18 = vector.broadcast %17 : f32 to vector<16x1xf32>
    %19 = arith.mulf %16, %18 : vector<16x1xf32>
    %20 = arith.addf %14, %19 : vector<16x1xf32>
    %c0_19 = arith.constant 0 : index
    %c3 = arith.constant 3 : index
    %c0_20 = arith.constant 0 : index
    %c0_21 = arith.constant 0 : index
    %21 = vector.load %arg3[%c0_19, %c3, %c0_20, %c0_21] : memref<1x8x16x1xf32, #tpu.memory_space<vmem>>, vector<1x1x16x1xf32>
    %22 = vector.shape_cast %21 : vector<1x1x16x1xf32> to vector<16x1xf32>
    %c3_22 = arith.constant 3 : index
    %23 = memref.load %arg4[%c3_22] : memref<8xf32, #tpu.memory_space<smem>>
    %24 = vector.broadcast %23 : f32 to vector<16x1xf32>
    %25 = arith.mulf %22, %24 : vector<16x1xf32>
    %26 = arith.addf %20, %25 : vector<16x1xf32>
    %c0_23 = arith.constant 0 : index
    %c4 = arith.constant 4 : index
    %c0_24 = arith.constant 0 : index
    %c0_25 = arith.constant 0 : index
    %27 = vector.load %arg3[%c0_23, %c4, %c0_24, %c0_25] : memref<1x8x16x1xf32, #tpu.memory_space<vmem>>, vector<1x1x16x1xf32>
    %28 = vector.shape_cast %27 : vector<1x1x16x1xf32> to vector<16x1xf32>
    %c4_26 = arith.constant 4 : index
    %29 = memref.load %arg4[%c4_26] : memref<8xf32, #tpu.memory_space<smem>>
    %30 = vector.broadcast %29 : f32 to vector<16x1xf32>
    %31 = arith.mulf %28, %30 : vector<16x1xf32>
    %32 = arith.addf %26, %31 : vector<16x1xf32>
    %c0_27 = arith.constant 0 : index
    %c5 = arith.constant 5 : index
    %c0_28 = arith.constant 0 : index
    %c0_29 = arith.constant 0 : index
    %33 = vector.load %arg3[%c0_27, %c5, %c0_28, %c0_29] : memref<1x8x16x1xf32, #tpu.memory_space<vmem>>, vector<1x1x16x1xf32>
    %34 = vector.shape_cast %33 : vector<1x1x16x1xf32> to vector<16x1xf32>
    %c5_30 = arith.constant 5 : index
    %35 = memref.load %arg4[%c5_30] : memref<8xf32, #tpu.memory_space<smem>>
    %36 = vector.broadcast %35 : f32 to vector<16x1xf32>
    %37 = arith.mulf %34, %36 : vector<16x1xf32>
    %38 = arith.addf %32, %37 : vector<16x1xf32>
    %c0_31 = arith.constant 0 : index
    %c6 = arith.constant 6 : index
    %c0_32 = arith.constant 0 : index
    %c0_33 = arith.constant 0 : index
    %39 = vector.load %arg3[%c0_31, %c6, %c0_32, %c0_33] : memref<1x8x16x1xf32, #tpu.memory_space<vmem>>, vector<1x1x16x1xf32>
    %40 = vector.shape_cast %39 : vector<1x1x16x1xf32> to vector<16x1xf32>
    %c6_34 = arith.constant 6 : index
    %41 = memref.load %arg4[%c6_34] : memref<8xf32, #tpu.memory_space<smem>>
    %42 = vector.broadcast %41 : f32 to vector<16x1xf32>
    %43 = arith.mulf %40, %42 : vector<16x1xf32>
    %44 = arith.addf %38, %43 : vector<16x1xf32>
    %c0_35 = arith.constant 0 : index
    %c7 = arith.constant 7 : index
    %c0_36 = arith.constant 0 : index
    %c0_37 = arith.constant 0 : index
    %45 = vector.load %arg3[%c0_35, %c7, %c0_36, %c0_37] : memref<1x8x16x1xf32, #tpu.memory_space<vmem>>, vector<1x1x16x1xf32>
    %46 = vector.shape_cast %45 : vector<1x1x16x1xf32> to vector<16x1xf32>
    %c7_38 = arith.constant 7 : index
    %47 = memref.load %arg4[%c7_38] : memref<8xf32, #tpu.memory_space<smem>>
    %48 = vector.broadcast %47 : f32 to vector<16x1xf32>
    %49 = arith.mulf %46, %48 : vector<16x1xf32>
    %50 = arith.addf %44, %49 : vector<16x1xf32>
    %51 = vector.shape_cast %50 : vector<16x1xf32> to vector<16x1x1xf32>
    %52 = vector.broadcast %51 : vector<16x1x1xf32> to vector<16x16x1xf32>
    %53 = arith.mulf %1, %52 : vector<16x16x1xf32>
    %cst = arith.constant dense<0.000000e+00> : vector<16x1xf32>
    %54 = vector.multi_reduction <add>, %53, %cst [0] : vector<16x16x1xf32> to vector<16x1xf32>
    %cst_39 = arith.constant dense<0.000000e+00> : vector<16x1xf32>
    %55 = vector.multi_reduction <add>, %1, %cst_39 [0] : vector<16x16x1xf32> to vector<16x1xf32>
    %c3_40 = arith.constant 3 : index
    %56 = memref.load %arg5[%c3_40] : memref<4xf32, #tpu.memory_space<smem>>
    %57 = vector.broadcast %56 : f32 to vector<16x1xf32>
    %58 = arith.mulf %57, %3 : vector<16x1xf32>
    %c2_41 = arith.constant 2 : index
    %59 = memref.load %arg5[%c2_41] : memref<4xf32, #tpu.memory_space<smem>>
    %60 = vector.broadcast %59 : f32 to vector<16x1xf32>
    %61 = arith.addf %58, %60 : vector<16x1xf32>
    %62 = arith.mulf %61, %3 : vector<16x1xf32>
    %c1_42 = arith.constant 1 : index
    %63 = memref.load %arg5[%c1_42] : memref<4xf32, #tpu.memory_space<smem>>
    %64 = vector.broadcast %63 : f32 to vector<16x1xf32>
    %65 = arith.addf %62, %64 : vector<16x1xf32>
    %66 = arith.mulf %65, %3 : vector<16x1xf32>
    %c0_43 = arith.constant 0 : index
    %67 = memref.load %arg5[%c0_43] : memref<4xf32, #tpu.memory_space<smem>>
    %68 = vector.broadcast %67 : f32 to vector<16x1xf32>
    %69 = arith.addf %66, %68 : vector<16x1xf32>
    %70 = arith.mulf %69, %55 : vector<16x1xf32>
    %71 = arith.mulf %70, %54 : vector<16x1xf32>
    %cst_44 = arith.constant dense<0.000000e+00> : vector<1xf32>
    %72 = vector.multi_reduction <add>, %71, %cst_44 [0] : vector<16x1xf32> to vector<1xf32>
    %73 = vector.shape_cast %72 : vector<1xf32> to vector<1x1xf32>
    %c0_45 = arith.constant 0 : index
    %74 = memref.load %arg6[%c0_45] : memref<1xf32, #tpu.memory_space<smem>>
    %75 = vector.broadcast %74 : f32 to vector<1x1xf32>
    %76 = arith.addf %73, %75 : vector<1x1xf32>
    %c0_46 = arith.constant 0 : index
    %c0_47 = arith.constant 0 : index
    %c0_48 = arith.constant 0 : index
    %77 = vector.load %arg7[%c0_46, %c0_47, %c0_48] : memref<1x1x1xf32, #tpu.memory_space<vmem>>, vector<1x1x1xf32>
    %78 = vector.shape_cast %77 : vector<1x1x1xf32> to vector<1x1xf32>
    %79 = vector.shape_cast %76 : vector<1x1xf32> to vector<1x1x1xf32>
    tpu.vector_store %arg7[%c0_46, %c0_47, %c0_48], %79 {strides = array<i32>} : memref<1x1x1xf32, #tpu.memory_space<vmem>>, vector<1x1x1xf32>,
    return
  }
  func.func @transform_0(%arg0: i32) -> (i32, i32, i32, i32) {
    %c0_i32 = arith.constant 0 : i32
    %c0_i32_0 = arith.constant 0 : i32
    %c0_i32_1 = arith.constant 0 : i32
    %c0_i32_2 = arith.constant 0 : i32
    return %arg0, %c0_i32, %c0_i32_0, %c0_i32_1 : i32, i32, i32, i32
  }
  func.func @transform_1(%arg0: i32) -> (i32, i32, i32) {
    %c0_i32 = arith.constant 0 : i32
    %c0_i32_0 = arith.constant 0 : i32
    %c0_i32_1 = arith.constant 0 : i32
    return %arg0, %c0_i32, %c0_i32_0 : i32, i32, i32
  }
  func.func @transform_2(%arg0: i32) -> (i32, i32, i32, i32) {
    %c0_i32 = arith.constant 0 : i32
    %c0_i32_0 = arith.constant 0 : i32
    %c0_i32_1 = arith.constant 0 : i32
    %c0_i32_2 = arith.constant 0 : i32
    return %arg0, %c0_i32, %c0_i32_0, %c0_i32_1 : i32, i32, i32, i32
  }
  func.func @transform_3(%arg0: i32) -> i32 {
    %c0_i32 = arith.constant 0 : i32
    %c0_i32_0 = arith.constant 0 : i32
    return %c0_i32 : i32
  }
  func.func @transform_4(%arg0: i32) -> i32 {
    %c0_i32 = arith.constant 0 : i32
    %c0_i32_0 = arith.constant 0 : i32
    return %c0_i32 : i32
  }
  func.func @transform_5(%arg0: i32) -> i32 {
    %c0_i32 = arith.constant 0 : i32
    %c0_i32_0 = arith.constant 0 : i32
    return %c0_i32 : i32
  }
  func.func @transform_6(%arg0: i32) -> (i32, i32, i32) {
    %c0_i32 = arith.constant 0 : i32
    %c0_i32_0 = arith.constant 0 : i32
    %c0_i32_1 = arith.constant 0 : i32
    return %arg0, %c0_i32, %c0_i32_0 : i32, i32, i32
  }
}

</mosaic_0001>

<bundles_post_ra>
// kernel: tpu_custom_call.1
= control target key start
LH: loop header
LB: loop body
LE: loop exit
PB: predicated region body
PF: predicated region fallthrough
CT: control target
= control target key end

     0   :  { %s1275_s0 = inlined_call_operand.vmem [shape: f32[2,16,16,1], index: 0, kind: input, shape index: {}]   ;;  %s1276_s1 = inlined_call_operand.vmem [shape: f32[2,16,1], index: 1, kind: input, shape index: {}]   ;;  %s1277_s2 = inlined_call_operand.vmem [shape: f32[2,8,16,1], index: 2, kind: input, shape index: {}]   ;;  %s1278_s3 = inlined_call_operand.vmem [shape: f32[8], index: 3, kind: input, shape index: {}]   ;;  %s1279_s4 = inlined_call_operand.vmem [shape: f32[4], index: 4, kind: input, shape index: {}]   ;;  %s1280_s5 = inlined_call_operand.<no memory space> [shape: f32[1], index: 5, kind: input, shape index: {}]   ;;  %s1281_s6 = inlined_call_operand.vmem [shape: f32[2,1,1], index: 6, kind: output, shape index: {}]  }
   0x1   :  { %11 = sst [smem:[#allocation2]] %s1280_s5 }
   0x2   :  { %12 = vsyncpa [#allocation4], 0 }
   0x3   :  { %13 = vsyncpa [#allocation6], 0  ;;  %s914_s23 = smov 0  }
   0x4 LB: > { %s755_s24 = sadd.s32 4294967295, %s872_s23   ;;  %p757_p0 = scmp.ge.s32.totalorder %s872_s23, 1  ;;  %s872_s23 = sphi %s914_s23, %s19_s23  }
   0x5   : > { %p191_p1 = scmp.lt.s32.totalorder %s872_s23, 3  ;;  %s203_s27 = sshll.u32 %s1278_s3, 4  ;;  %s204_s27 = int_to_ptr.vmem [resolvable:$true] %s203_s27 }
   0x6   : > { %p814_p3 = scmp.eq.s32.totalorder %s755_s24, 0  ;;  %s213_s29 = sshll.u32 %s1279_s4, 4  ;;  %s214_s29 = int_to_ptr.vmem [resolvable:$true] %s213_s29 }
   0x7   : > { %p192_p2 = pnand %p757_p0, %p191_p1  ;;  %s874_s30 = smov [#allocation3]  }
   0x8   : > { %s875_s7 = smov [#allocation5]  }
   0x9   : > { %p807_p4 = pneg %p192_p2 }
   0xa   : > { %253 = sbr.rel (%p192_p2) target bundleno = 114 (0x72), region = 44 }
   0xb   : > { %p808_p5 = pnand %p814_p3, %p807_p4 }
   0xd   : > { %810 = dma.vmem_to_smem (!%p808_p5), %s204_s27, 16, %s874_s30, [#allocation4]  }
   0xe   : > { %813 = dma.vmem_to_smem (!%p808_p5), %s214_s29, 16, %s875_s7, [#allocation6]  }
   0xf   : > { %863 = dma.done.wait (%p814_p3), [#allocation4], 16  }
  0x10   : > { %865 = vsyncadd (%p814_p3), [#allocation4], 4294967280 }
  0x11   : > { %867 = dma.done.wait (%p814_p3), [#allocation6], 16  }
  0x12   : > { %869 = vsyncadd (%p814_p3), [#allocation6], 4294967280 }
  0x13   : > { %265 = sfence }
  0x14   : > { %p298_p6 = scmp.lt.s32.totalorder %s755_s24, 1  ;;  %s352_s8 = sld [smem:[#allocation3]]  ;;  %vm499_vm0 = vcmask 7168   ;;  %vm660_vm1 = vcmask 0  }
  0x15   : > { %s772_s9 = sld [smem:[#allocation3 + $0x1]] }
  0x16   : > { %s1283_s24 = smov (!%p298_p6, %s755_s24), 1  ;;  %s775_s10 = sld [smem:[#allocation3 + $0x2]] }
  0x17   : > { %s935_s11 = sld [smem:[#allocation3 + $0x3]]  ;;  %s798_s12 = sshll.u32 %s1283_s24, 7 }
  0x18   : > { %s938_s13 = sld [smem:[#allocation3 + $0x4]]  ;;  %s796_s15 = sshll.u32 %s1283_s24, 8 }
  0x19   : > { %s940_s14 = sld [smem:[#allocation3 + $0x5]]  ;;  %s948_s19 = scalar_lea.vmem %s1277_s2, %s798_s12 }
  0x1a   : > { %s943_s16 = sld [smem:[#allocation3 + $0x6]]  ;;  %v353_v0 = vstv %s352_s8  ;;  %s955_s25 = scalar_lea.vmem %s1275_s0, %s796_s15  ;;  %v350_v3 = vld [vmem:[%s948_s19] sm:$0xff]  ;;  %v351_v4 = vld [vmem:[%s948_s19 + $0x8] sm:$0xff]  ;;  %v770_v7 = vld [vmem:[%s948_s19 + $0x10] sm:$0xff] }
  0x1b   : > { %s950_s20 = sld [smem:[#allocation3 + $0x7]]  ;;  %v360_v1 = vstv %s772_s9  ;;  %v354_v5 = vmul.f32 %v353_v0, %v350_v3  ;;  %v355_v6 = vmul.f32 %v353_v0, %v351_v4  ;;  %v771_v8 = vld [vmem:[%s948_s19 + $0x18] sm:$0xff]  ;;  %v773_v9 = vld [vmem:[%s948_s19 + $0x20] sm:$0xff]  ;;  %v774_v14 = vld [vmem:[%s948_s19 + $0x28] sm:$0xff]  ;;  %s797_s27 = sshll.u32 %s1283_s24, 4 }
  0x1c   : > { %v369_v2 = vstv %s775_s10  ;;  %v964_v11 = vld [vmem:[%s955_s25] sm:$0xff]  ;;  %v361_v12 = vmul.f32 %v770_v7, %v360_v1  ;;  %v362_v13 = vmul.f32 %v771_v8, %v360_v1  ;;  %v776_v16 = vld [vmem:[%s948_s19 + $0x30] sm:$0xff]  ;;  %v777_v17 = vld [vmem:[%s948_s19 + $0x38] sm:$0xff]  ;;  %s1191_s26 = sld [smem:[#allocation5 + $0x3]]  ;;  %s307_s30 = scalar_lea.vmem %s1276_s1, %s797_s27 }
  0x1d   : > { %v378_v10 = vstv %s935_s11  ;;  %v370_v15 = vmul.f32 %v773_v9, %v369_v2  ;;  %v371_v19 = vmul.f32 %v774_v14, %v369_v2  ;;  %v779_v20 = vld [vmem:[%s948_s19 + $0x40] sm:$0xff]  ;;  %v780_v21 = vld [vmem:[%s948_s19 + $0x48] sm:$0xff]  ;;  %v782_v22 = vld [vmem:[%s948_s19 + $0x50] sm:$0xff]  ;;  %v562_v45 = vsel %vm499_vm0, %v964_v11, 0.0  ;;  %s1198_s5 = sld [smem:[#allocation5 + $0x2]]  ;;  %s315_s12 = scalar_lea.vmem %s1281_s6, %s1283_s24 }
  0x1e   : > { %v387_v18 = vstv %s938_s13  ;;  %v975_v24 = vld [vmem:[%s955_s25 + $0x10] sm:$0xff]  ;;  %v978_v25 = vld [vmem:[%s955_s25 + $0x20] sm:$0xff]  ;;  %v363_v26 = vadd.f32 %v361_v12, %v354_v5  ;;  %v364_v27 = vadd.f32 %v362_v13, %v355_v6  ;;  %v379_v28 = vmul.f32 %v776_v16, %v378_v10  ;;  %v783_v30 = vld [vmem:[%s948_s19 + $0x58] sm:$0xff]  ;;  %s1219_s7 = sld [smem:[#allocation5 + $0x1]] }
  0x1f   : > { %v396_v23 = vstv %s940_s14  ;;  %v380_v29 = vmul.f32 %v777_v17, %v378_v10  ;;  %v982_v31 = vld [vmem:[%s955_s25 + $0x8] sm:$0xff]  ;;  %v985_v32 = vld [vmem:[%s955_s25 + $0x18] sm:$0xff]  ;;  %v388_v33 = vmul.f32 %v779_v20, %v387_v18  ;;  %v990_v36 = vld [vmem:[%s955_s25 + $0x30] sm:$0xff]  ;;  %v389_v39 = vmul.f32 %v780_v21, %v387_v18  ;;  %s1237_s8 = sld [smem:[#allocation5]] }
  0x20   : > { %v405_v34 = vstv %s943_s16  ;;  %v372_v37 = vadd.f32 %v370_v15, %v363_v26  ;;  %v373_v38 = vadd.f32 %v371_v19, %v364_v27  ;;  %v397_v40 = vmul.f32 %v782_v22, %v396_v23  ;;  %v785_v41 = vld [vmem:[%s948_s19 + $0x60] sm:$0xff]  ;;  %v786_v42 = vld [vmem:[%s948_s19 + $0x68] sm:$0xff]  ;;  %v788_v50 = vld [vmem:[%s948_s19 + $0x70] sm:$0xff]  ;;  %s657_s9 = sld [smem:[#allocation2]] }
  0x21   : > { %v414_v35 = vstv %s950_s20  ;;  %v995_v43 = vld [vmem:[%s955_s25 + $0x28] sm:$0xff]  ;;  %v398_v44 = vmul.f32 %v783_v30, %v396_v23  ;;  %v563_v46 = vsel %vm499_vm0, %v975_v24, 0.0  ;;  %v565_v47 = vsel %vm499_vm0, %v978_v25, 0.0  ;;  %v1007_v53 = vld [vmem:[%s955_s25 + $0x40] sm:$0xff]  ;;  %v1014_v58 = vld [vmem:[%s955_s25 + $0x38] sm:$0xff] }
  0x22   : > { %v381_v48 = vadd.f32 %v379_v28, %v372_v37  ;;  %v382_v49 = vadd.f32 %v380_v29, %v373_v38  ;;  %v564_v51 = vadd.f32 %v563_v46, %v562_v45  ;;  %v593_v52 = vsel %vm499_vm0, %v982_v31, 0.0  ;;  %v789_v63 = vld [vmem:[%s948_s19 + $0x78] sm:$0xff]  ;;  %v1022_v6 = vld [vmem:[%s955_s25 + $0x50] sm:$0xff]  ;;  %v1027_v9 = vld [vmem:[%s955_s25 + $0x48] sm:$0xff] }
  0x23   : > { %v406_v54 = vmul.f32 %v785_v41, %v405_v34  ;;  %v407_v55 = vmul.f32 %v786_v42, %v405_v34  ;;  %v567_v56 = vsel %vm499_vm0, %v990_v36, 0.0  ;;  %v594_v57 = vsel %vm499_vm0, %v985_v32, 0.0  ;;  %v1030_v14 = vld [vmem:[%s955_s25 + $0x58] sm:$0xff]  ;;  %v1033_v16 = vld [vmem:[%s955_s25 + $0x60] sm:$0xff]  ;;  %v1036_v17 = vld [vmem:[%s955_s25 + $0x68] sm:$0xff] }
  0x24   : > { %v390_v59 = vadd.f32 %v388_v33, %v381_v48  ;;  %v391_v60 = vadd.f32 %v389_v39, %v382_v49  ;;  %v566_v61 = vadd.f32 %v565_v47, %v564_v51  ;;  %v596_v62 = vsel %vm499_vm0, %v995_v43, 0.0  ;;  %v1039_v18 = vld [vmem:[%s955_s25 + $0x70] sm:$0xff]  ;;  %v331_v27 = vld [vmem:[%s955_s25 + $0x78] sm:$0xff] }
  0x25   : > { %v415_v0 = vmul.f32 %v788_v50, %v414_v35  ;;  %v595_v1 = vadd.f32 %v594_v57, %v593_v52  ;;  %v569_v5 = vsel %vm499_vm0, %v1007_v53, 0.0  ;;  %v598_v8 = vsel %vm499_vm0, %v1014_v58, 0.0 }
  0x26   : > { %v399_v2 = vadd.f32 %v397_v40, %v390_v59  ;;  %v400_v3 = vadd.f32 %v398_v44, %v391_v60  ;;  %v568_v4 = vadd.f32 %v567_v56, %v566_v61  ;;  %v416_v13 = vmul.f32 %v789_v63, %v414_v35 }
  0x27   : > { %v597_v7 = vadd.f32 %v596_v62, %v595_v1  ;;  %v571_v20 = vsel %vm499_vm0, %v1022_v6, 0.0  ;;  %v600_v22 = vsel %vm499_vm0, %v1027_v9, 0.0  ;;  %v1049_v26 = vsel %vm499_vm0, %v1030_v14, 0.0 }
  0x28   : > { %v408_v10 = vadd.f32 %v406_v54, %v399_v2  ;;  %v409_v12 = vadd.f32 %v407_v55, %v400_v3  ;;  %v570_v15 = vadd.f32 %v569_v5, %v568_v4  ;;  %v1056_v29 = vsel %vm499_vm0, %v1033_v16, 0.0 }
  0x29   : > { %v599_v21 = vadd.f32 %v598_v8, %v597_v7  ;;  %v1060_v30 = vsel %vm499_vm0, %v1039_v18, 0.0  ;;  %v1064_v33 = vsel %vm499_vm0, %v1036_v17, 0.0  ;;  %v1072_v47 = vsel %vm499_vm0, %v331_v27, 0.0  ;;  %v1080_v7 = vld [vmem:[%s955_s25 + $0x80] sm:$0xff] }
  0x2a   : > { %v417_v19 = vadd.f32 %v415_v0, %v408_v10  ;;  %v1045_v23 = vadd.f32 %v416_v13, %v409_v12  ;;  %v1052_v28 = vadd.f32 %v571_v20, %v570_v15  ;;  %v1087_v15 = vld [vmem:[%s955_s25 + $0x88] sm:$0xff]  ;;  %v1093_v20 = vld [vmem:[%s955_s25 + $0x98] sm:$0xff] }
  0x2b   : > { %v1066_v38 = vadd.f32 %v600_v22, %v599_v21 }
  0x2c   : > { %v421_v34 = vrot.slane %v417_v19, 1  ;;  %v422_v35 = vrot.slane %v417_v19, 2  ;;  %v423_v37 = vrot.slane %v417_v19, 3  ;;  %v424_v39 = vrot.slane %v417_v19, 4 }
  0x2d   : > { %v425_v40 = vrot.slane %v417_v19, 5  ;;  %v426_v41 = vrot.slane %v417_v19, 6  ;;  %v427_v42 = vrot.slane %v417_v19, 7  ;;  %v428_v44 = vrot.slane %v1045_v23, 1 }
  0x2e   : > { %v429_v45 = vrot.slane %v1045_v23, 2  ;;  %v430_v46 = vrot.slane %v1045_v23, 3  ;;  %v431_v48 = vrot.slane %v1045_v23, 4  ;;  %v432_v49 = vrot.slane %v1045_v23, 5 }
  0x2f   : > { %v433_v50 = vrot.slane %v1045_v23, 6  ;;  %v434_v51 = vrot.slane %v1045_v23, 7  ;;  %v435_v52 = vperm.slane %v417_v19, 0  ;;  %v436_v54 = vperm.slane %v421_v34, 0  ;;  %v1090_v19 = vld [vmem:[%s955_s25 + $0x90] sm:$0xff] }
  0x30   : > { %v437_v55 = vperm.slane %v422_v35, 0  ;;  %v438_v56 = vperm.slane %v423_v37, 0  ;;  %v439_v57 = vperm.slane %v424_v39, 0  ;;  %v440_v59 = vperm.slane %v425_v40, 0  ;;  %v1110_v35 = vld [vmem:[%s955_s25 + $0xb0] sm:$0xff] }
  0x31   : > { %v441_v60 = vperm.slane %v426_v41, 0  ;;  %v442_v61 = vperm.slane %v427_v42, 0  ;;  %v443_v62 = vperm.slane %v1045_v23, 0  ;;  %v444_v63 = vperm.slane %v428_v44, 0  ;;  %v1125_v40 = vld [vmem:[%s955_s25 + $0xd0] sm:$0xff] }
  0x32   : > { %v445_v0 = vperm.slane %v429_v45, 0  ;;  %v446_v1 = vperm.slane %v430_v46, 0  ;;  %v447_v2 = vperm.slane %v431_v48, 0  ;;  %v448_v3 = vperm.slane %v432_v49, 0  ;;  %v1145_v49 = vld [vmem:[%s955_s25 + $0xf0] sm:$0xff] }
  0x33   : > { %v449_v4 = vperm.slane %v433_v50, 0  ;;  %v450_v5 = vperm.slane %v434_v51, 0  ;;  %v467_v8 = vmul.f32 %v435_v52, %v964_v11  ;;  %v468_v10 = vmul.f32 %v435_v52, %v982_v31  ;;  %v1100_v31 = vld [vmem:[%s955_s25 + $0xa0] sm:$0xff]  ;;  %v1148_v50 = vld [vmem:[%s955_s25 + $0xf8] sm:$0xff] }
  0x34   : > { %v469_v12 = vmul.f32 %v436_v54, %v975_v24  ;;  %v470_v13 = vmul.f32 %v436_v54, %v985_v32  ;;  %v471_v21 = vmul.f32 %v437_v55, %v978_v25  ;;  %v472_v22 = vmul.f32 %v437_v55, %v995_v43  ;;  %v1103_v32 = vld [vmem:[%s955_s25 + $0xa8] sm:$0xff] }
  0x35   : > { %v473_v11 = vmul.f32 %v438_v56, %v990_v36  ;;  %v474_v24 = vmul.f32 %v438_v56, %v1014_v58  ;;  %v475_v23 = vmul.f32 %v439_v57, %v1007_v53  ;;  %v476_v34 = vmul.f32 %v439_v57, %v1027_v9  ;;  %v1113_v36 = vld [vmem:[%s955_s25 + $0xb8] sm:$0xff]  ;;  %v1119_v9 = vld [vmem:[%s955_s25 + $0xc0] sm:$0xff] }
  0x36   : > { %v477_v25 = vmul.f32 %v440_v59, %v1022_v6  ;;  %v478_v43 = vmul.f32 %v440_v59, %v1030_v14  ;;  %v479_v58 = vmul.f32 %v441_v60, %v1033_v16  ;;  %v480_v37 = vmul.f32 %v441_v60, %v1036_v17  ;;  %v1122_v6 = vld [vmem:[%s955_s25 + $0xc8] sm:$0xff]  ;;  %v1132_v17 = vld [vmem:[%s955_s25 + $0xd8] sm:$0xff] }
  0x37   : > { %v481_v39 = vmul.f32 %v442_v61, %v1039_v18  ;;  %v482_v53 = vmul.f32 %v442_v61, %v331_v27  ;;  %v483_v14 = vmul.f32 %v443_v62, %v1080_v7  ;;  %v484_v41 = vmul.f32 %v443_v62, %v1087_v15  ;;  %v1135_v18 = vld [vmem:[%s955_s25 + $0xe0] sm:$0xff]  ;;  %v1138_v27 = vld [vmem:[%s955_s25 + $0xe8] sm:$0xff] }
  0x38   : > { %v485_v42 = vmul.f32 %v444_v63, %v1090_v19  ;;  %v486_v16 = vmul.f32 %v444_v63, %v1093_v20  ;;  %v487_v44 = vmul.f32 %v445_v0, %v1100_v31  ;;  %v488_v45 = vmul.f32 %v445_v0, %v1103_v32 }
  0x39   : > { %v500_v46 = vsel %vm499_vm0, %v467_v8, 0.0  ;;  %v501_v48 = vsel %vm499_vm0, %v469_v12, 0.0  ;;  %v489_v51 = vmul.f32 %v446_v1, %v1110_v35  ;;  %v490_v52 = vmul.f32 %v446_v1, %v1113_v36 }
  0x3a   : > { %v502_v54 = vadd.f32 %v501_v48, %v500_v46  ;;  %v503_v55 = vsel %vm499_vm0, %v471_v21, 0.0  ;;  %v491_v56 = vmul.f32 %v447_v2, %v1119_v9  ;;  %v492_v57 = vmul.f32 %v447_v2, %v1122_v6 }
  0x3b   : > { %v493_v59 = vmul.f32 %v448_v3, %v1125_v40  ;;  %v505_v60 = vsel %vm499_vm0, %v473_v11, 0.0  ;;  %v494_v61 = vmul.f32 %v448_v3, %v1132_v17  ;;  %v495_v62 = vmul.f32 %v449_v4, %v1135_v18 }
  0x3c   : > { %v1160_v63 = vmul.f32 %v449_v4, %v1138_v27  ;;  %v504_v0 = vadd.f32 %v503_v55, %v502_v54  ;;  %v497_v1 = vmul.f32 %v450_v5, %v1145_v49  ;;  %v1164_v8 = vmul.f32 %v450_v5, %v1148_v50 }
  0x3d   : > { %v507_v12 = vsel %vm499_vm0, %v475_v23, 0.0  ;;  %v509_v2 = vsel %vm499_vm0, %v477_v25, 0.0  ;;  %v531_v11 = vsel %vm499_vm0, %v468_v10, 0.0  ;;  %v532_v3 = vsel %vm499_vm0, %v470_v13, 0.0 }
  0x3e   : > { %v506_v21 = vadd.f32 %v505_v60, %v504_v0  ;;  %v534_v46 = vsel %vm499_vm0, %v472_v22, 0.0  ;;  %v511_v4 = vsel %vm499_vm0, %v479_v58, 0.0  ;;  %v513_v48 = vsel %vm499_vm0, %v481_v39, 0.0 }
  0x3f   : > { %v515_v54 = vsel %vm499_vm0, %v483_v14, 0.0  ;;  %v533_v5 = vadd.f32 %v532_v3, %v531_v11  ;;  %v517_v23 = vsel %vm499_vm0, %v485_v42, 0.0  ;;  %v519_v25 = vsel %vm499_vm0, %v487_v44, 0.0  ;;  %v349_v11 = vld [vmem:[%s307_s30 + $0x8] sm:$0xff] }
  0x40   : > { %v508_v55 = vadd.f32 %v507_v12, %v506_v21  ;;  %v536_v60 = vsel %vm499_vm0, %v474_v24, 0.0  ;;  %v521_v10 = vsel %vm499_vm0, %v489_v51, 0.0  ;;  %v1179_v13 = vsel %vm499_vm0, %v491_v56, 0.0 }
  0x41   : > { %v1182_v22 = vsel %vm499_vm0, %v493_v59, 0.0  ;;  %v535_v58 = vadd.f32 %v534_v46, %v533_v5  ;;  %v1185_v14 = vsel %vm499_vm0, %v495_v62, 0.0  ;;  %v1188_v0 = vsel %vm499_vm0, %v497_v1, 0.0 }
  0x42   : > { %v510_v39 = vadd.f32 %v509_v2, %v508_v55  ;;  %v538_v42 = vsel %vm499_vm0, %v476_v34, 0.0  ;;  %v540_v44 = vsel %vm499_vm0, %v478_v43, 0.0  ;;  %v542_v51 = vsel %vm499_vm0, %v480_v37, 0.0 }
  0x43   : > { %v537_v24 = vadd.f32 %v536_v60, %v535_v58  ;;  %v574_v56 = vadd.f32 %v1056_v29, %v1052_v28  ;;  %v544_v62 = vsel %vm499_vm0, %v482_v53, 0.0  ;;  %v546_v1 = vsel %vm499_vm0, %v484_v41, 0.0 }
  0x44   : > { %v512_v59 = vadd.f32 %v511_v4, %v510_v39  ;;  %v577_v34 = vsel %vm499_vm0, %v1080_v7, 0.0  ;;  %v548_v2 = vsel %vm499_vm0, %v486_v16, 0.0  ;;  %v550_v43 = vsel %vm499_vm0, %v488_v45, 0.0 }
  0x45   : > { %v539_v12 = vadd.f32 %v538_v42, %v537_v24  ;;  %v576_v37 = vadd.f32 %v1060_v30, %v574_v56  ;;  %v552_v29 = vsel %vm499_vm0, %v490_v52, 0.0  ;;  %v579_v53 = vsel %vm499_vm0, %v1090_v19, 0.0 }
  0x46   : > { %v514_v28 = vadd.f32 %v513_v48, %v512_v59  ;;  %v603_v7 = vadd.f32 %v1049_v26, %v1066_v38  ;;  %v554_v16 = vsel %vm499_vm0, %v492_v57, 0.0  ;;  %v1217_v45 = vsel %vm499_vm0, %v494_v61, 0.0  ;;  %v348_v38 = vld [vmem:[%s307_s30] sm:$0xff] }
  0x47   : > { %v541_v41 = vadd.f32 %v540_v44, %v539_v12  ;;  %v578_v30 = vadd.f32 %v577_v34, %v576_v37  ;;  %v581_v52 = vsel %vm499_vm0, %v1100_v31, 0.0  ;;  %v583_v19 = vsel %vm499_vm0, %v1110_v35, 0.0 }
  0x48   : > { %v516_v21 = vadd.f32 %v515_v54, %v514_v28  ;;  %v605_v26 = vadd.f32 %v1064_v33, %v603_v7  ;;  %v585_v61 = vsel %vm499_vm0, %v1119_v9, 0.0  ;;  %v608_v46 = vsel %vm499_vm0, %v1087_v15, 0.0 }
  0x49   : > { %v543_v57 = vadd.f32 %v542_v51, %v541_v41  ;;  %v580_v3 = vadd.f32 %v579_v53, %v578_v30  ;;  %v587_v31 = vsel %vm499_vm0, %v1125_v40, 0.0  ;;  %v610_v35 = vsel %vm499_vm0, %v1093_v20, 0.0 }
  0x4a   : > { %v518_v4 = vadd.f32 %v517_v23, %v516_v21  ;;  %v607_v48 = vadd.f32 %v1072_v47, %v605_v26  ;;  %v625_v5 = vstv %s1191_s26  ;;  %v629_v55 = vstv %s1198_s5 }
  0x4b   : > { %v545_v33 = vadd.f32 %v544_v62, %v543_v57  ;;  %v582_v54 = vadd.f32 %v581_v52, %v580_v3  ;;  %v626_v58 = vmul.f32 %v625_v5, %v348_v38  ;;  %v627_v15 = vmul.f32 %v625_v5, %v349_v11 }
  0x4c   : > { %v520_v9 = vadd.f32 %v519_v25, %v518_v4  ;;  %v609_v60 = vadd.f32 %v608_v46, %v607_v48  ;;  %v589_v40 = vsel %vm499_vm0, %v1135_v18, 0.0  ;;  %v612_v47 = vsel %vm499_vm0, %v1103_v32, 0.0 }
  0x4d   : > { %v547_v23 = vadd.f32 %v546_v1, %v545_v33  ;;  %v584_v39 = vadd.f32 %v583_v19, %v582_v54  ;;  %v630_v24 = vadd.f32 %v629_v55, %v626_v58  ;;  %v631_v44 = vadd.f32 %v629_v55, %v627_v15 }
  0x4e   : > { %v522_v20 = vadd.f32 %v521_v10, %v520_v9  ;;  %v611_v42 = vadd.f32 %v610_v35, %v609_v60  ;;  %v614_v25 = vsel %vm499_vm0, %v1113_v36, 0.0  ;;  %v635_v59 = vstv %s1219_s7 }
  0x4f   : > { %v549_v51 = vadd.f32 %v548_v2, %v547_v23  ;;  %v586_v56 = vadd.f32 %v585_v61, %v584_v39  ;;  %v632_v34 = vmul.f32 %v630_v24, %v348_v38  ;;  %v633_v12 = vmul.f32 %v631_v44, %v349_v11 }
  0x50   : > { %v524_v62 = vadd.f32 %v1179_v13, %v522_v20  ;;  %v613_v1 = vadd.f32 %v612_v47, %v611_v42  ;;  %v591_v32 = vsel %vm499_vm0, %v1145_v49, 0.0  ;;  %v616_v10 = vsel %vm499_vm0, %v1122_v6, 0.0 }
  0x51   : > { %v551_v18 = vadd.f32 %v550_v43, %v549_v51  ;;  %v588_v37 = vadd.f32 %v587_v31, %v586_v56  ;;  %v636_v53 = vadd.f32 %v635_v59, %v632_v34  ;;  %v637_v36 = vadd.f32 %v635_v59, %v633_v12 }
  0x52   : > { %v526_v2 = vadd.f32 %v1182_v22, %v524_v62  ;;  %v615_v28 = vadd.f32 %v614_v25, %v613_v1  ;;  %v618_v13 = vsel %vm499_vm0, %v1132_v17, 0.0  ;;  %v641_v30 = vstv %s1237_s8 }
  0x53   : > { %v553_v7 = vadd.f32 %v552_v29, %v551_v18  ;;  %v590_v41 = vadd.f32 %v589_v40, %v588_v37  ;;  %v638_v52 = vmul.f32 %v636_v53, %v348_v38  ;;  %v639_v19 = vmul.f32 %v637_v36, %v349_v11 }
  0x54   : > { %v528_v43 = vadd.f32 %v1185_v14, %v526_v2  ;;  %v617_v21 = vadd.f32 %v616_v10, %v615_v28  ;;  %v620_v6 = vsel %vm499_vm0, %v1138_v27, 0.0  ;;  %v558_v29 = vsel %vm499_vm0, %v1160_v63, 0.0 }
  0x55   : > { %v555_v49 = vadd.f32 %v554_v16, %v553_v7  ;;  %v592_v26 = vadd.f32 %v591_v32, %v590_v41  ;;  %v642_v3 = vadd.f32 %v641_v30, %v638_v52  ;;  %v622_v14 = vsel %vm499_vm0, %v1148_v50, 0.0 }
  0x56   : > { %v530_v22 = vadd.f32 %v1188_v0, %v528_v43  ;;  %v619_v57 = vadd.f32 %v618_v13, %v617_v21  ;;  %v560_v38 = vsel %vm499_vm0, %v1164_v8, 0.0  ;;  %v643_v11 = vadd.f32 %v641_v30, %v639_v19 }
  0x57   : > { %v557_v17 = vadd.f32 %v1217_v45, %v555_v49  ;;  %v644_v61 = vmul.f32 %v642_v3, %v592_v26  ;;  %v658_v55 = vstv %s657_s9 }
  0x58   : > { %v621_v16 = vadd.f32 %v620_v6, %v619_v57 }
  0x59   : > { %v559_v46 = vadd.f32 %v558_v29, %v557_v17  ;;  %v646_v0 = vmul.f32 %v644_v61, %v530_v22 }
  0x5a   : > { %v623_v27 = vadd.f32 %v622_v14, %v621_v16 }
  0x5b   : > { %v561_v4 = vadd.f32 %v560_v38, %v559_v46  ;;  %v648_v48 = vsel %vm499_vm0, %v646_v0, 0.0 }
  0x5c   : > { %v645_v31 = vmul.f32 %v643_v11, %v623_v27 }
  0x5e   : > { %v647_v63 = vmul.f32 %v645_v31, %v561_v4 }
  0x60   : > { %v649_v45 = vsel %vm499_vm0, %v647_v63, 0.0 }
  0x61   : > { %v650_v35 = vadd.f32 %v649_v45, %v648_v48 }
  0x63   : > { %v651_v33 = vrot.slane %v650_v35, 4 }
  0x65   : > { %v652_v50 = vadd.f32 %v651_v33, %v650_v35 }
  0x67   : > { %v653_v54 = vrot.slane %v652_v50, 2 }
  0x69   : > { %v654_v8 = vadd.f32 %v653_v54, %v652_v50 }
  0x6b   : > { %v655_v5 = vrot.slane %v654_v8, 1 }
  0x6d   : > { %v656_v9 = vadd.f32 %v655_v5, %v654_v8 }
  0x6f   : > { %v659_v60 = vadd.f32 %v658_v55, %v656_v9 }
  0x71   : > { %661 = vst.msk [vmem:[%s315_s12] sm:$0x1] %vm660_vm1, %v659_v60 }
  0x72 PF: > { %s19_s23 = sadd.s32 1, %s872_s23  }
  0x73   : > { %p16_p7 = scmp.ge.s32.totalorder %s19_s23, 4  }
  0x75   :  { %18 = sbr.rel (!%p16_p7) target bundleno = 4 (0x4), region = 96 }
  0x7a   :  { %679 = vsyncpa [#allocation4], 1 }
  0x7b   :  { %681 = vsyncpa [#allocation4 + $0x1], 1 }
  0x7c   :  { %682 = vsyncpa [#allocation6], 1 }

</bundles_post_ra>
